<compile_context>
chip_gen: v5e
topology: v5e:2x2
jax: 0.10.0
libtpu: 0.0.40
codegen_flags: <defaults>
</compile_context>

<pallas_src>
import jax
import jax.numpy as jnp
from jax.experimental import pallas as pl
from jax.experimental.pallas import tpu as pltpu


def _pointwise_convT_kernel(x_ref, w_ref, b_ref, o_ref):
    # x_ref: (B_N, Cin, T)  VMEM  (lanes = spatial, sublanes = Cin)
    # w_ref: (Cin, Cout)    SMEM  (scalar table)
    # b_ref: (Cout,)        SMEM  (scalar table)
    # o_ref: (B_N, Cout, T) VMEM
    b_n, cin, _ = x_ref.shape
    _, cout, _ = o_ref.shape

    # All loop bounds are tiny static ints -> fully unrolled VPU FMAs.
    for n in range(b_n):
        for o in range(cout):
            acc = x_ref[n, 0:1, :] * w_ref[0, o]
            for c in range(1, cin):
                acc = acc + x_ref[n, c:c + 1, :] * w_ref[c, o]
            # Direct per-channel store: keeps live set to one (1, T) strip.
            o_ref[n, o:o + 1, :] = (acc + b_ref[o]).astype(o_ref.dtype)


def _largest_divisor_le(n, cap):
    cap = max(1, min(n, cap))
    for d in range(cap, 0, -1):
        if n % d == 0:
            return d
    return 1


def conv_transpose_1x1(x_nchw, weight, bias):
    """ConvTranspose2d(kernel_size=1, stride=1, padding=0).

    x_nchw : (N, Cin, H, W) float32
    weight : (Cin, Cout, 1, 1) float32  (PyTorch ConvTranspose2d weight layout)
    bias   : (Cout,) float32
    returns: (N, Cout, H, W) float32
    """
    N, Cin, H, W = x_nchw.shape
    Cout = weight.shape[1]
    HW = H * W

    # NCHW -> (N, Cin, HW): pure reshape, no data movement.
    x3 = x_nchw.reshape(N, Cin, HW)
    w_mat = weight.reshape(Cin, Cout)
    b_vec = bias.reshape(Cout)

    # Pad spatial axis to a multiple of 128 so the lane dim is always dense
    # (unmasked stores) and a single block never needs the full unaligned
    # extent (VMEM-safe on every generation). Padded columns are sliced off.
    hw_pad = ((HW + 127) // 128) * 128
    if hw_pad != HW:
        x3 = jnp.pad(x3, ((0, 0), (0, 0), (0, hw_pad - HW)))

    # --- Lane tile: largest 128-multiple divisor of hw_pad, capped at 64K ---
    LANE_CAP = 65536  # elements; ~8 MiB total double-buffered f32 blocks
    m = hw_pad // 128
    d = _largest_divisor_le(m, LANE_CAP // 128)
    t_hw = 128 * d

    # --- Batch block: amortize per-step overhead when the spatial tile is
    # small. Cap the unroll factor to keep compile time sane. ---
    if t_hw < LANE_CAP:
        target_bn = max(1, min(16, LANE_CAP // t_hw))
        b_n = _largest_divisor_le(N, target_bn)
    else:
        b_n = 1

    # --- Megacore: keep >= 2 grid steps when possible (v7x has 2 TCs). ---
    if (N // b_n) * (hw_pad // t_hw) < 2:
        if b_n > 1:
            b_n = _largest_divisor_le(N, b_n // 2)
        elif hw_pad // t_hw == 1 and m >= 2:
            d = _largest_divisor_le(m, max(1, m // 2))
            t_hw = 128 * d

    grid = (N // b_n, hw_pad // t_hw)

    out3 = pl.pallas_call(
        _pointwise_convT_kernel,
        out_shape=jax.ShapeDtypeStruct((N, Cout, hw_pad), x_nchw.dtype),
        grid=grid,
        in_specs=[
            pl.BlockSpec((b_n, Cin, t_hw), lambda n, t: (n, 0, t)),
            pl.BlockSpec(memory_space=pltpu.MemorySpace.SMEM),   # weights
            pl.BlockSpec(memory_space=pltpu.MemorySpace.SMEM),   # bias
        ],
        out_specs=pl.BlockSpec((b_n, Cout, t_hw), lambda n, t: (n, 0, t)),
        compiler_params=pltpu.CompilerParams(
            dimension_semantics=("parallel", "parallel"),
        ),
        cost_estimate=pl.CostEstimate(
            flops=2 * N * HW * Cin * Cout,
            transcendentals=0,
            bytes_accessed=4 * N * HW * (Cin + Cout) + 4 * (Cin * Cout + Cout),
        ),
    )(x3, w_mat, b_vec)

    # Slice off spatial padding (no-op if aligned), then reshape back to NCHW.
    if hw_pad != HW:
        out3 = out3[:, :, :HW]
    return out3.reshape(N, Cout, H, W)


if __name__ == "__main__":
    key = jax.random.PRNGKey(0)
    k_x, k_w, k_b = jax.random.split(key, 3)

    # Small valid NCHW input consistent with in_channels=3 / out_channels=5.
    N, Cin, Cout, H, W = 2, 3, 5, 16, 16
    x = jax.random.normal(k_x, (N, Cin, H, W), dtype=jnp.float32)

    # Deterministic parameter init (ConvTranspose2d weight: (Cin, Cout, 1, 1)).
    fan_in = Cout * 1 * 1  # PyTorch's fan_in convention for ConvTranspose2d
    bound = 1.0 / (fan_in ** 0.5)
    weight = jax.random.uniform(
        k_w, (Cin, Cout, 1, 1), dtype=jnp.float32, minval=-bound, maxval=bound
    )
    bias = jax.random.uniform(
        k_b, (Cout,), dtype=jnp.float32, minval=-bound, maxval=bound
    )

    out = conv_transpose_1x1(x, weight, bias)
    jax.block_until_ready(out)

    # Reference check in plain JAX (same math).
    ref = (
        jnp.einsum("nchw,co->nohw", x, weight.reshape(Cin, Cout))
        + bias.reshape(1, Cout, 1, 1)
    )
    assert out.shape == (N, Cout, H, W)
    assert jnp.allclose(out, ref, atol=1e-5, rtol=1e-5)

    print("KERNEL_OK")
</pallas_src>

<mosaic_0001>
module attributes {stable_mosaic.version = 11 : i64} {
  func.func @_pointwise_convT_kernel(%arg0: i32, %arg1: i32, %arg2: memref<1x3x256xf32, #tpu.memory_space<vmem>>, %arg3: memref<3x5xf32, #tpu.memory_space<smem>>, %arg4: memref<5xf32, #tpu.memory_space<smem>>, %arg5: memref<1x5x256xf32, #tpu.memory_space<vmem>>) attributes {dimension_semantics = [#tpu.dimension_semantics<parallel>, #tpu.dimension_semantics<parallel>], iteration_bounds = array<i64: 2, 1>, scalar_prefetch = 0 : i64, scratch_operands = 0 : i64, tpu.core_type = #tpu.core_type<tc>, window_params = [{transform_indices = @transform_0, window_bounds = array<i64: 1, 3, 256>}, {transform_indices = @transform_1, window_bounds = array<i64: 3, 5>}, {transform_indices = @transform_2, window_bounds = array<i64: 5>}, {transform_indices = @transform_3, window_bounds = array<i64: 1, 5, 256>}]} {
    %c0 = arith.constant 0 : index
    %c0_0 = arith.constant 0 : index
    %c0_1 = arith.constant 0 : index
    %0 = vector.load %arg2[%c0, %c0_0, %c0_1] : memref<1x3x256xf32, #tpu.memory_space<vmem>>, vector<1x1x256xf32>
    %1 = vector.shape_cast %0 : vector<1x1x256xf32> to vector<1x256xf32>
    %c0_2 = arith.constant 0 : index
    %c0_3 = arith.constant 0 : index
    %2 = memref.load %arg3[%c0_2, %c0_3] : memref<3x5xf32, #tpu.memory_space<smem>>
    %3 = vector.broadcast %2 : f32 to vector<1x256xf32>
    %4 = arith.mulf %1, %3 : vector<1x256xf32>
    %c0_4 = arith.constant 0 : index
    %c1 = arith.constant 1 : index
    %c0_5 = arith.constant 0 : index
    %5 = vector.load %arg2[%c0_4, %c1, %c0_5] : memref<1x3x256xf32, #tpu.memory_space<vmem>>, vector<1x1x256xf32>
    %6 = vector.shape_cast %5 : vector<1x1x256xf32> to vector<1x256xf32>
    %c1_6 = arith.constant 1 : index
    %c0_7 = arith.constant 0 : index
    %7 = memref.load %arg3[%c1_6, %c0_7] : memref<3x5xf32, #tpu.memory_space<smem>>
    %8 = vector.broadcast %7 : f32 to vector<1x256xf32>
    %9 = arith.mulf %6, %8 : vector<1x256xf32>
    %10 = arith.addf %4, %9 : vector<1x256xf32>
    %c0_8 = arith.constant 0 : index
    %c2 = arith.constant 2 : index
    %c0_9 = arith.constant 0 : index
    %11 = vector.load %arg2[%c0_8, %c2, %c0_9] : memref<1x3x256xf32, #tpu.memory_space<vmem>>, vector<1x1x256xf32>
    %12 = vector.shape_cast %11 : vector<1x1x256xf32> to vector<1x256xf32>
    %c2_10 = arith.constant 2 : index
    %c0_11 = arith.constant 0 : index
    %13 = memref.load %arg3[%c2_10, %c0_11] : memref<3x5xf32, #tpu.memory_space<smem>>
    %14 = vector.broadcast %13 : f32 to vector<1x256xf32>
    %15 = arith.mulf %12, %14 : vector<1x256xf32>
    %16 = arith.addf %10, %15 : vector<1x256xf32>
    %c0_12 = arith.constant 0 : index
    %17 = memref.load %arg4[%c0_12] : memref<5xf32, #tpu.memory_space<smem>>
    %18 = vector.broadcast %17 : f32 to vector<1x256xf32>
    %19 = arith.addf %16, %18 : vector<1x256xf32>
    %c0_13 = arith.constant 0 : index
    %c0_14 = arith.constant 0 : index
    %c0_15 = arith.constant 0 : index
    %20 = vector.load %arg5[%c0_13, %c0_14, %c0_15] : memref<1x5x256xf32, #tpu.memory_space<vmem>>, vector<1x1x256xf32>
    %21 = vector.shape_cast %20 : vector<1x1x256xf32> to vector<1x256xf32>
    %22 = vector.shape_cast %19 : vector<1x256xf32> to vector<1x1x256xf32>
    tpu.vector_store %arg5[%c0_13, %c0_14, %c0_15], %22 {strides = array<i32>} : memref<1x5x256xf32, #tpu.memory_space<vmem>>, vector<1x1x256xf32>,
    %c0_16 = arith.constant 0 : index
    %c0_17 = arith.constant 0 : index
    %c0_18 = arith.constant 0 : index
    %23 = vector.load %arg2[%c0_16, %c0_17, %c0_18] : memref<1x3x256xf32, #tpu.memory_space<vmem>>, vector<1x1x256xf32>
    %24 = vector.shape_cast %23 : vector<1x1x256xf32> to vector<1x256xf32>
    %c0_19 = arith.constant 0 : index
    %c1_20 = arith.constant 1 : index
    %25 = memref.load %arg3[%c0_19, %c1_20] : memref<3x5xf32, #tpu.memory_space<smem>>
    %26 = vector.broadcast %25 : f32 to vector<1x256xf32>
    %27 = arith.mulf %24, %26 : vector<1x256xf32>
    %c0_21 = arith.constant 0 : index
    %c1_22 = arith.constant 1 : index
    %c0_23 = arith.constant 0 : index
    %28 = vector.load %arg2[%c0_21, %c1_22, %c0_23] : memref<1x3x256xf32, #tpu.memory_space<vmem>>, vector<1x1x256xf32>
    %29 = vector.shape_cast %28 : vector<1x1x256xf32> to vector<1x256xf32>
    %c1_24 = arith.constant 1 : index
    %c1_25 = arith.constant 1 : index
    %30 = memref.load %arg3[%c1_24, %c1_25] : memref<3x5xf32, #tpu.memory_space<smem>>
    %31 = vector.broadcast %30 : f32 to vector<1x256xf32>
    %32 = arith.mulf %29, %31 : vector<1x256xf32>
    %33 = arith.addf %27, %32 : vector<1x256xf32>
    %c0_26 = arith.constant 0 : index
    %c2_27 = arith.constant 2 : index
    %c0_28 = arith.constant 0 : index
    %34 = vector.load %arg2[%c0_26, %c2_27, %c0_28] : memref<1x3x256xf32, #tpu.memory_space<vmem>>, vector<1x1x256xf32>
    %35 = vector.shape_cast %34 : vector<1x1x256xf32> to vector<1x256xf32>
    %c2_29 = arith.constant 2 : index
    %c1_30 = arith.constant 1 : index
    %36 = memref.load %arg3[%c2_29, %c1_30] : memref<3x5xf32, #tpu.memory_space<smem>>
    %37 = vector.broadcast %36 : f32 to vector<1x256xf32>
    %38 = arith.mulf %35, %37 : vector<1x256xf32>
    %39 = arith.addf %33, %38 : vector<1x256xf32>
    %c1_31 = arith.constant 1 : index
    %40 = memref.load %arg4[%c1_31] : memref<5xf32, #tpu.memory_space<smem>>
    %41 = vector.broadcast %40 : f32 to vector<1x256xf32>
    %42 = arith.addf %39, %41 : vector<1x256xf32>
    %c0_32 = arith.constant 0 : index
    %c1_33 = arith.constant 1 : index
    %c0_34 = arith.constant 0 : index
    %43 = vector.load %arg5[%c0_32, %c1_33, %c0_34] : memref<1x5x256xf32, #tpu.memory_space<vmem>>, vector<1x1x256xf32>
    %44 = vector.shape_cast %43 : vector<1x1x256xf32> to vector<1x256xf32>
    %45 = vector.shape_cast %42 : vector<1x256xf32> to vector<1x1x256xf32>
    tpu.vector_store %arg5[%c0_32, %c1_33, %c0_34], %45 {strides = array<i32>} : memref<1x5x256xf32, #tpu.memory_space<vmem>>, vector<1x1x256xf32>,
    %c0_35 = arith.constant 0 : index
    %c0_36 = arith.constant 0 : index
    %c0_37 = arith.constant 0 : index
    %46 = vector.load %arg2[%c0_35, %c0_36, %c0_37] : memref<1x3x256xf32, #tpu.memory_space<vmem>>, vector<1x1x256xf32>
    %47 = vector.shape_cast %46 : vector<1x1x256xf32> to vector<1x256xf32>
    %c0_38 = arith.constant 0 : index
    %c2_39 = arith.constant 2 : index
    %48 = memref.load %arg3[%c0_38, %c2_39] : memref<3x5xf32, #tpu.memory_space<smem>>
    %49 = vector.broadcast %48 : f32 to vector<1x256xf32>
    %50 = arith.mulf %47, %49 : vector<1x256xf32>
    %c0_40 = arith.constant 0 : index
    %c1_41 = arith.constant 1 : index
    %c0_42 = arith.constant 0 : index
    %51 = vector.load %arg2[%c0_40, %c1_41, %c0_42] : memref<1x3x256xf32, #tpu.memory_space<vmem>>, vector<1x1x256xf32>
    %52 = vector.shape_cast %51 : vector<1x1x256xf32> to vector<1x256xf32>
    %c1_43 = arith.constant 1 : index
    %c2_44 = arith.constant 2 : index
    %53 = memref.load %arg3[%c1_43, %c2_44] : memref<3x5xf32, #tpu.memory_space<smem>>
    %54 = vector.broadcast %53 : f32 to vector<1x256xf32>
    %55 = arith.mulf %52, %54 : vector<1x256xf32>
    %56 = arith.addf %50, %55 : vector<1x256xf32>
    %c0_45 = arith.constant 0 : index
    %c2_46 = arith.constant 2 : index
    %c0_47 = arith.constant 0 : index
    %57 = vector.load %arg2[%c0_45, %c2_46, %c0_47] : memref<1x3x256xf32, #tpu.memory_space<vmem>>, vector<1x1x256xf32>
    %58 = vector.shape_cast %57 : vector<1x1x256xf32> to vector<1x256xf32>
    %c2_48 = arith.constant 2 : index
    %c2_49 = arith.constant 2 : index
    %59 = memref.load %arg3[%c2_48, %c2_49] : memref<3x5xf32, #tpu.memory_space<smem>>
    %60 = vector.broadcast %59 : f32 to vector<1x256xf32>
    %61 = arith.mulf %58, %60 : vector<1x256xf32>
    %62 = arith.addf %56, %61 : vector<1x256xf32>
    %c2_50 = arith.constant 2 : index
    %63 = memref.load %arg4[%c2_50] : memref<5xf32, #tpu.memory_space<smem>>
    %64 = vector.broadcast %63 : f32 to vector<1x256xf32>
    %65 = arith.addf %62, %64 : vector<1x256xf32>
    %c0_51 = arith.constant 0 : index
    %c2_52 = arith.constant 2 : index
    %c0_53 = arith.constant 0 : index
    %66 = vector.load %arg5[%c0_51, %c2_52, %c0_53] : memref<1x5x256xf32, #tpu.memory_space<vmem>>, vector<1x1x256xf32>
    %67 = vector.shape_cast %66 : vector<1x1x256xf32> to vector<1x256xf32>
    %68 = vector.shape_cast %65 : vector<1x256xf32> to vector<1x1x256xf32>
    tpu.vector_store %arg5[%c0_51, %c2_52, %c0_53], %68 {strides = array<i32>} : memref<1x5x256xf32, #tpu.memory_space<vmem>>, vector<1x1x256xf32>,
    %c0_54 = arith.constant 0 : index
    %c0_55 = arith.constant 0 : index
    %c0_56 = arith.constant 0 : index
    %69 = vector.load %arg2[%c0_54, %c0_55, %c0_56] : memref<1x3x256xf32, #tpu.memory_space<vmem>>, vector<1x1x256xf32>
    %70 = vector.shape_cast %69 : vector<1x1x256xf32> to vector<1x256xf32>
    %c0_57 = arith.constant 0 : index
    %c3 = arith.constant 3 : index
    %71 = memref.load %arg3[%c0_57, %c3] : memref<3x5xf32, #tpu.memory_space<smem>>
    %72 = vector.broadcast %71 : f32 to vector<1x256xf32>
    %73 = arith.mulf %70, %72 : vector<1x256xf32>
    %c0_58 = arith.constant 0 : index
    %c1_59 = arith.constant 1 : index
    %c0_60 = arith.constant 0 : index
    %74 = vector.load %arg2[%c0_58, %c1_59, %c0_60] : memref<1x3x256xf32, #tpu.memory_space<vmem>>, vector<1x1x256xf32>
    %75 = vector.shape_cast %74 : vector<1x1x256xf32> to vector<1x256xf32>
    %c1_61 = arith.constant 1 : index
    %c3_62 = arith.constant 3 : index
    %76 = memref.load %arg3[%c1_61, %c3_62] : memref<3x5xf32, #tpu.memory_space<smem>>
    %77 = vector.broadcast %76 : f32 to vector<1x256xf32>
    %78 = arith.mulf %75, %77 : vector<1x256xf32>
    %79 = arith.addf %73, %78 : vector<1x256xf32>
    %c0_63 = arith.constant 0 : index
    %c2_64 = arith.constant 2 : index
    %c0_65 = arith.constant 0 : index
    %80 = vector.load %arg2[%c0_63, %c2_64, %c0_65] : memref<1x3x256xf32, #tpu.memory_space<vmem>>, vector<1x1x256xf32>
    %81 = vector.shape_cast %80 : vector<1x1x256xf32> to vector<1x256xf32>
    %c2_66 = arith.constant 2 : index
    %c3_67 = arith.constant 3 : index
    %82 = memref.load %arg3[%c2_66, %c3_67] : memref<3x5xf32, #tpu.memory_space<smem>>
    %83 = vector.broadcast %82 : f32 to vector<1x256xf32>
    %84 = arith.mulf %81, %83 : vector<1x256xf32>
    %85 = arith.addf %79, %84 : vector<1x256xf32>
    %c3_68 = arith.constant 3 : index
    %86 = memref.load %arg4[%c3_68] : memref<5xf32, #tpu.memory_space<smem>>
    %87 = vector.broadcast %86 : f32 to vector<1x256xf32>
    %88 = arith.addf %85, %87 : vector<1x256xf32>
    %c0_69 = arith.constant 0 : index
    %c3_70 = arith.constant 3 : index
    %c0_71 = arith.constant 0 : index
    %89 = vector.load %arg5[%c0_69, %c3_70, %c0_71] : memref<1x5x256xf32, #tpu.memory_space<vmem>>, vector<1x1x256xf32>
    %90 = vector.shape_cast %89 : vector<1x1x256xf32> to vector<1x256xf32>
    %91 = vector.shape_cast %88 : vector<1x256xf32> to vector<1x1x256xf32>
    tpu.vector_store %arg5[%c0_69, %c3_70, %c0_71], %91 {strides = array<i32>} : memref<1x5x256xf32, #tpu.memory_space<vmem>>, vector<1x1x256xf32>,
    %c0_72 = arith.constant 0 : index
    %c0_73 = arith.constant 0 : index
    %c0_74 = arith.constant 0 : index
    %92 = vector.load %arg2[%c0_72, %c0_73, %c0_74] : memref<1x3x256xf32, #tpu.memory_space<vmem>>, vector<1x1x256xf32>
    %93 = vector.shape_cast %92 : vector<1x1x256xf32> to vector<1x256xf32>
    %c0_75 = arith.constant 0 : index
    %c4 = arith.constant 4 : index
    %94 = memref.load %arg3[%c0_75, %c4] : memref<3x5xf32, #tpu.memory_space<smem>>
    %95 = vector.broadcast %94 : f32 to vector<1x256xf32>
    %96 = arith.mulf %93, %95 : vector<1x256xf32>
    %c0_76 = arith.constant 0 : index
    %c1_77 = arith.constant 1 : index
    %c0_78 = arith.constant 0 : index
    %97 = vector.load %arg2[%c0_76, %c1_77, %c0_78] : memref<1x3x256xf32, #tpu.memory_space<vmem>>, vector<1x1x256xf32>
    %98 = vector.shape_cast %97 : vector<1x1x256xf32> to vector<1x256xf32>
    %c1_79 = arith.constant 1 : index
    %c4_80 = arith.constant 4 : index
    %99 = memref.load %arg3[%c1_79, %c4_80] : memref<3x5xf32, #tpu.memory_space<smem>>
    %100 = vector.broadcast %99 : f32 to vector<1x256xf32>
    %101 = arith.mulf %98, %100 : vector<1x256xf32>
    %102 = arith.addf %96, %101 : vector<1x256xf32>
    %c0_81 = arith.constant 0 : index
    %c2_82 = arith.constant 2 : index
    %c0_83 = arith.constant 0 : index
    %103 = vector.load %arg2[%c0_81, %c2_82, %c0_83] : memref<1x3x256xf32, #tpu.memory_space<vmem>>, vector<1x1x256xf32>
    %104 = vector.shape_cast %103 : vector<1x1x256xf32> to vector<1x256xf32>
    %c2_84 = arith.constant 2 : index
    %c4_85 = arith.constant 4 : index
    %105 = memref.load %arg3[%c2_84, %c4_85] : memref<3x5xf32, #tpu.memory_space<smem>>
    %106 = vector.broadcast %105 : f32 to vector<1x256xf32>
    %107 = arith.mulf %104, %106 : vector<1x256xf32>
    %108 = arith.addf %102, %107 : vector<1x256xf32>
    %c4_86 = arith.constant 4 : index
    %109 = memref.load %arg4[%c4_86] : memref<5xf32, #tpu.memory_space<smem>>
    %110 = vector.broadcast %109 : f32 to vector<1x256xf32>
    %111 = arith.addf %108, %110 : vector<1x256xf32>
    %c0_87 = arith.constant 0 : index
    %c4_88 = arith.constant 4 : index
    %c0_89 = arith.constant 0 : index
    %112 = vector.load %arg5[%c0_87, %c4_88, %c0_89] : memref<1x5x256xf32, #tpu.memory_space<vmem>>, vector<1x1x256xf32>
    %113 = vector.shape_cast %112 : vector<1x1x256xf32> to vector<1x256xf32>
    %114 = vector.shape_cast %111 : vector<1x256xf32> to vector<1x1x256xf32>
    tpu.vector_store %arg5[%c0_87, %c4_88, %c0_89], %114 {strides = array<i32>} : memref<1x5x256xf32, #tpu.memory_space<vmem>>, vector<1x1x256xf32>,
    return
  }
  func.func @transform_0(%arg0: i32, %arg1: i32) -> (i32, i32, i32) {
    %c0_i32 = arith.constant 0 : i32
    %c0_i32_0 = arith.constant 0 : i32
    return %arg0, %c0_i32, %arg1 : i32, i32, i32
  }
  func.func @transform_1(%arg0: i32, %arg1: i32) -> (i32, i32) {
    %c0_i32 = arith.constant 0 : i32
    %c0_i32_0 = arith.constant 0 : i32
    %c0_i32_1 = arith.constant 0 : i32
    return %c0_i32, %c0_i32_0 : i32, i32
  }
  func.func @transform_2(%arg0: i32, %arg1: i32) -> i32 {
    %c0_i32 = arith.constant 0 : i32
    %c0_i32_0 = arith.constant 0 : i32
    return %c0_i32 : i32
  }
  func.func @transform_3(%arg0: i32, %arg1: i32) -> (i32, i32, i32) {
    %c0_i32 = arith.constant 0 : i32
    %c0_i32_0 = arith.constant 0 : i32
    return %arg0, %c0_i32, %arg1 : i32, i32, i32
  }
}

</mosaic_0001>

<bundles_post_ra>
// kernel: tpu_custom_call.1
= control target key start
LH: loop header
LB: loop body
LE: loop exit
PB: predicated region body
PF: predicated region fallthrough
CT: control target
= control target key end

     0   :  { %8 = vsyncpa [#allocation3], 0  ;;  %s734_s0 = inlined_call_operand.vmem [shape: f32[2,3,256], index: 0, kind: input, shape index: {}]   ;;  %s735_s1 = inlined_call_operand.vmem [shape: f32[3,5], index: 1, kind: input, shape index: {}]   ;;  %s736_s2 = inlined_call_operand.vmem [shape: f32[5], index: 2, kind: input, shape index: {}]   ;;  %s737_s3 = inlined_call_operand.vmem [shape: f32[2,5,256], index: 3, kind: output, shape index: {}]  }
   0x1   :  { %9 = vsyncpa [#allocation5], 0  ;;  %s629_s12 = smov 0   ;;  %s631_s13 = smov 0  }
   0x2   :  { %s633_s14 = smov 0  }
   0x3 LB: > { %s451_s15 = sadd.s32 4294967295, %s605_s14   ;;  %s27_s16 = sadd.s32 1, %s601_s13  ;;  %s605_s14 = sphi %s633_s14, %s15_s14   ;;  %s601_s13 = sphi %s631_s13, %s742_s13   ;;  %s597_s12 = sphi %s629_s12, %s741_s12  }
   0x4   : > { %p29_p0 = scmp.ge.s32.totalorder %s27_s16, 2  ;;  %p453_p1 = scmp.ge.s32.totalorder %s605_s14, 1 }
   0x5   : > { %p130_p2 = scmp.lt.s32.totalorder %s605_s14, 3  ;;  %p650_p4 = scmp.eq.s32.totalorder %s451_s15, 0 }
   0x6   : > { %s744_s16 = smov (%p29_p0, %s27_s16), 0  ;;  %s142_s20 = sshll.u32 %s735_s1, 4  ;;  %s143_s20 = int_to_ptr.vmem [resolvable:$true] %s142_s20 }
   0x7   : > { %p131_p3 = pnand %p453_p1, %p130_p2  ;;  %s152_s23 = sshll.u32 %s736_s2, 4  ;;  %s153_s23 = int_to_ptr.vmem [resolvable:$true] %s152_s23 }
   0x8   : > { %s607_s24 = smov [#allocation2]   ;;  %s608_s25 = smov [#allocation4]  }
   0x9   : > { %p508_p5 = pneg %p131_p3 }
   0xa   : > { %178 = sbr.rel (%p131_p3) target bundleno = 54 (0x36), region = 32 }
   0xb   : > { %p509_p6 = pnand %p650_p4, %p508_p5 }
   0xd   : > { %511 = dma.vmem_to_smem (!%p509_p6), %s143_s20, 64, %s607_s24, [#allocation3]  }
   0xe   : > { %514 = dma.vmem_to_smem (!%p509_p6), %s153_s23, 16, %s608_s25, [#allocation5]  }
   0xf   : > { %588 = dma.done.wait (%p650_p4), [#allocation3], 64  }
  0x10   : > { %590 = vsyncadd (%p650_p4), [#allocation3], 4294967232 }
  0x11   : > { %592 = dma.done.wait (%p650_p4), [#allocation5], 16  }
  0x12   : > { %594 = vsyncadd (%p650_p4), [#allocation5], 4294967280 }
  0x13   : > { %190 = sfence }
  0x14   : > { %p218_p7 = scmp.lt.s32.totalorder %s597_s12, 1  ;;  %s238_s26 = sld [smem:[#allocation2]]  ;;  %v256_v8 = vlaneseq }
  0x15   : > { %s465_s27 = sld [smem:[#allocation2 + $0x80]] }
  0x16   : > { %s746_s12 = smov (!%p218_p7, %s597_s12), 1  ;;  %s467_s28 = sld [smem:[#allocation2 + $0x100]]  ;;  %vm688_vm0 = vcmp.lt.s32.totalorder %v256_v8, 256 }
  0x17   : > { %s498_s29 = sshll.u32 %s746_s12, 3  ;;  %s253_s6 = sld [smem:[#allocation4]] }
  0x18   : > { %s675_s5 = scalar_lea.vmem %s734_s0, %s498_s29  ;;  %s468_s7 = sld [smem:[#allocation2 + $0x1]] }
  0x19   : > { %v237_v0 = vld [vmem:[%s675_s5] ss:$4 sm:$0x3]  ;;  %v464_v2 = vld [vmem:[%s675_s5 + $0x1] ss:$4 sm:$0x3] }
  0x1a   : > { %v239_v1 = vstv %s238_s26  ;;  %v466_v5 = vld [vmem:[%s675_s5 + $0x2] ss:$4 sm:$0x3]  ;;  %s470_s8 = sld [smem:[#allocation2 + $0x81]]  ;;  %s499_s9 = sshll.u32 %s746_s12, 4 }
  0x1b   : > { %v240_v3 = vmul.f32 %v239_v1, %v237_v0  ;;  %v244_v4 = vstv %s465_s27  ;;  %s472_s10 = sld [smem:[#allocation2 + $0x101]]  ;;  %v262_v12 = vld [vmem:[%s675_s5] ss:$4 sm:$0x3]  ;;  %s686_s19 = scalar_lea.vmem %s737_s3, %s499_s9 }
  0x1c   : > { %v245_v6 = vmul.f32 %v464_v2, %v244_v4  ;;  %v250_v7 = vstv %s467_s28  ;;  %s680_s11 = sld [smem:[#allocation4 + $0x1]]  ;;  %v469_v15 = vld [vmem:[%s675_s5 + $0x1] ss:$4 sm:$0x3] }
  0x1d   : > { %v251_v10 = vmul.f32 %v466_v5, %v250_v7  ;;  %s475_s15 = sld [smem:[#allocation2 + $0x2]]  ;;  %v254_v13 = vstv %s253_s6  ;;  %v471_v18 = vld [vmem:[%s675_s5 + $0x2] ss:$4 sm:$0x3] }
  0x1e   : > { %v246_v9 = vadd.f32 %v245_v6, %v240_v3  ;;  %s477_s12 = sld [smem:[#allocation2 + $0x82]]  ;;  %v264_v17 = vstv %s468_s7  ;;  %v282_v21 = vld [vmem:[%s675_s5] ss:$4 sm:$0x3] }
  0x1f   : > { %s479_s20 = sld [smem:[#allocation2 + $0x102]]  ;;  %v265_v19 = vmul.f32 %v264_v17, %v262_v12  ;;  %v476_v25 = vld [vmem:[%s675_s5 + $0x1] ss:$4 sm:$0x3] }
  0x20   : > { %v252_v11 = vadd.f32 %v251_v10, %v246_v9  ;;  %v268_v20 = vstv %s470_s8  ;;  %s695_s21 = sld [smem:[#allocation4 + $0x2]]  ;;  %v478_v28 = vld [vmem:[%s675_s5 + $0x2] ss:$4 sm:$0x3] }
  0x21   : > { %v269_v22 = vmul.f32 %v469_v15, %v268_v20  ;;  %v273_v23 = vstv %s472_s10  ;;  %s482_s22 = sld [smem:[#allocation2 + $0x3]]  ;;  %v302_v35 = vld [vmem:[%s675_s5] ss:$4 sm:$0x3] }
  0x22   : > { %v255_v16 = vadd.f32 %v254_v13, %v252_v11  ;;  %v274_v24 = vmul.f32 %v471_v18, %v273_v23  ;;  %s484_s23 = sld [smem:[#allocation2 + $0x83]]  ;;  %v277_v29 = vstv %s680_s11  ;;  %v483_v37 = vld [vmem:[%s675_s5 + $0x1] ss:$4 sm:$0x3] }
  0x23   : > { %v270_v26 = vadd.f32 %v269_v22, %v265_v19  ;;  %v284_v27 = vstv %s475_s15  ;;  %s486_s24 = sld [smem:[#allocation2 + $0x103]]  ;;  %v485_v41 = vld [vmem:[%s675_s5 + $0x2] ss:$4 sm:$0x3] }
  0x24   : > { %260 = vst.msk [vmem:[%s686_s19] ss:$8 sm:$0x3] %vm688_vm0, %v255_v16  ;;  %v285_v30 = vmul.f32 %v284_v27, %v282_v21  ;;  %v288_v31 = vstv %s477_s12  ;;  %s703_s25 = sld [smem:[#allocation4 + $0x3]] }
  0x25   : > { %v275_v32 = vadd.f32 %v274_v24, %v270_v26  ;;  %v289_v33 = vmul.f32 %v476_v25, %v288_v31  ;;  %v293_v34 = vstv %s479_s20  ;;  %s489_s26 = sld [smem:[#allocation2 + $0x4]]  ;;  %v322_v48 = vld [vmem:[%s675_s5] ss:$4 sm:$0x3] }
  0x26   : > { %v294_v36 = vmul.f32 %v478_v28, %v293_v34  ;;  %s491_s27 = sld [smem:[#allocation2 + $0x84]]  ;;  %v297_v42 = vstv %s695_s21  ;;  %v490_v50 = vld [vmem:[%s675_s5 + $0x1] ss:$4 sm:$0x3] }
  0x27   : > { %v278_v38 = vadd.f32 %v277_v29, %v275_v32  ;;  %v290_v39 = vadd.f32 %v289_v33, %v285_v30  ;;  %v304_v40 = vstv %s482_s22  ;;  %s493_s28 = sld [smem:[#allocation2 + $0x104]]  ;;  %v492_v54 = vld [vmem:[%s675_s5 + $0x2] ss:$4 sm:$0x3] }
  0x28   : > { %v305_v43 = vmul.f32 %v304_v40, %v302_v35  ;;  %v308_v44 = vstv %s484_s23  ;;  %s494_s29 = sld [smem:[#allocation4 + $0x4]] }
  0x29   : > { %474 = vst.msk [vmem:[%s686_s19 + $0x1] ss:$8 sm:$0x3] %vm688_vm0, %v278_v38  ;;  %v295_v45 = vadd.f32 %v294_v36, %v290_v39  ;;  %v309_v46 = vmul.f32 %v483_v37, %v308_v44  ;;  %v313_v47 = vstv %s486_s24 }
  0x2a   : > { %v314_v49 = vmul.f32 %v485_v41, %v313_v47  ;;  %v317_v55 = vstv %s703_s25 }
  0x2b   : > { %v298_v51 = vadd.f32 %v297_v42, %v295_v45  ;;  %v310_v52 = vadd.f32 %v309_v46, %v305_v43  ;;  %v324_v53 = vstv %s489_s26 }
  0x2c   : > { %v325_v56 = vmul.f32 %v324_v53, %v322_v48  ;;  %v328_v57 = vstv %s491_s27 }
  0x2d   : > { %481 = vst.msk [vmem:[%s686_s19 + $0x2] ss:$8 sm:$0x3] %vm688_vm0, %v298_v51  ;;  %v315_v58 = vadd.f32 %v314_v49, %v310_v52  ;;  %v329_v59 = vmul.f32 %v490_v50, %v328_v57  ;;  %v333_v60 = vstv %s493_s28 }
  0x2e   : > { %v334_v61 = vmul.f32 %v492_v54, %v333_v60  ;;  %v337_v0 = vstv %s494_s29 }
  0x2f   : > { %v318_v62 = vadd.f32 %v317_v55, %v315_v58  ;;  %v330_v63 = vadd.f32 %v329_v59, %v325_v56 }
  0x31   : > { %488 = vst.msk [vmem:[%s686_s19 + $0x3] ss:$8 sm:$0x3] %vm688_vm0, %v318_v62  ;;  %v335_v1 = vadd.f32 %v334_v61, %v330_v63 }
  0x33   : > { %v338_v2 = vadd.f32 %v337_v0, %v335_v1 }
  0x35   : > { %495 = vst.msk [vmem:[%s686_s19 + $0x4] ss:$8 sm:$0x3] %vm688_vm0, %v338_v2 }
  0x36 PF: > { %s15_s14 = sadd.s32 1, %s605_s14   ;;  %s741_s12 = smov %s601_s13 }
  0x37   : > { %p12_p8 = scmp.ge.s32.totalorder %s15_s14, 4   ;;  %s742_s13 = smov %s744_s16 }
  0x39   :  { %14 = sbr.rel (!%p12_p8) target bundleno = 3 (0x3), region = 77 }
  0x3e   :  { %372 = vsyncpa [#allocation3], 1 }
  0x3f   :  { %374 = vsyncpa [#allocation3 + $0x1], 1 }
  0x40   :  { %375 = vsyncpa [#allocation5], 1 }

</bundles_post_ra>
